<compile_context>
chip_gen: v6e
topology: v6e:2x2x1
jax: 0.10.0
libtpu: 0.0.40
codegen_flags: <defaults>
</compile_context>

<pallas_src>
import jax
import jax.numpy as jnp
from jax.experimental import pallas as pl
from jax.experimental.pallas import tpu as pltpu


def mlp_kernel(x_ref, w1_ref, b1_ref, w2_ref, b2_ref,
               w3_ref, b3_ref, w4_ref, b4_ref, o_ref):
    x = x_ref[...]

    # fc1 + relu
    h1 = jnp.dot(x, w1_ref[...], preferred_element_type=jnp.float32) + b1_ref[...]
    h1 = jnp.maximum(h1, 0.0)

    # fc2 + relu
    h2 = jnp.dot(h1, w2_ref[...], preferred_element_type=jnp.float32) + b2_ref[...]
    h2 = jnp.maximum(h2, 0.0)

    # fc3 + relu  (w3_ref is the pre-sliced (32, 64) weight — see module note)
    h3 = jnp.dot(h2, w3_ref[...], preferred_element_type=jnp.float32) + b3_ref[...]
    h3 = jnp.maximum(h3, 0.0)

    # fc4 (no activation), lane-dense 128-wide output slab
    o_ref[...] = (jnp.dot(h3, w4_ref[...], preferred_element_type=jnp.float32)
                  + b4_ref[...]).astype(o_ref.dtype)


def _pick_tm(B, requested):
    """Pick a batch tile: big (amortize per-step overhead), sublane-aligned,
    and leaving >= 2 grid steps when possible (v7x dual TensorCore)."""
    tm = 1024 if requested is None else requested
    tm = min(tm, B)
    if tm < B:
        tm = max(8, (tm // 8) * 8)        # non-full tiles must be a multiple of 8
    elif B >= 16 and (B % 16) == 0:
        tm = max(8, (B // 2 // 8) * 8)    # split so both TCs get work on v7x
    return tm


def mlp_forward(x, params, *, tm=None):
    """x: (B, input_dim) f32.  params: dict of transposed weights / biases."""
    B, d_in = x.shape
    w1t, b1 = params["w1t"], params["b1"]   # (d_in, 32), (1, 32)
    w2t, b2 = params["w2t"], params["b2"]   # (32, 32),   (1, 32)
    w3t, b3 = params["w3t"], params["b3"]   # (64, 64),   (1, 64)
    w4t, b4 = params["w4t"], params["b4"]   # (64, C),    (1, C)
    num_classes = w4t.shape[1]

    # fc2 output is 32-wide -> only the first 32 rows of fc3's (64, 64) weight
    # can contribute; slice once here (free, outside the kernel).
    w3t_eff = w3t[:32, :]

    # Lane-dense output: pad fc4 to a multiple-of-128 output width so every
    # output store in the kernel is an unmasked full-lane vst.
    n_pad = ((num_classes + 127) // 128) * 128
    w4t_pad = jnp.zeros((w4t.shape[0], n_pad), w4t.dtype).at[:, :num_classes].set(w4t)
    b4_pad = jnp.zeros((1, n_pad), b4.dtype).at[:, :num_classes].set(b4)

    tm = _pick_tm(B, tm)
    grid = (pl.cdiv(B, tm),)

    def full_spec(shape):
        # broadcast operand (weights / biases): same whole block every step
        return pl.BlockSpec(shape, lambda i: (0, 0))

    out = pl.pallas_call(
        mlp_kernel,
        out_shape=jax.ShapeDtypeStruct((B, n_pad), jnp.float32),
        grid_spec=pltpu.PrefetchScalarGridSpec(
            num_scalar_prefetch=0,
            grid=grid,
            in_specs=[
                pl.BlockSpec((tm, d_in), lambda i: (i, 0)),
                full_spec(w1t.shape), full_spec(b1.shape),
                full_spec(w2t.shape), full_spec(b2.shape),
                full_spec(w3t_eff.shape), full_spec(b3.shape),
                full_spec(w4t_pad.shape), full_spec(b4_pad.shape),
            ],
            out_specs=pl.BlockSpec((tm, n_pad), lambda i: (i, 0)),
        ),
        compiler_params=pltpu.CompilerParams(
            dimension_semantics=("parallel",)),
    )(x, w1t, b1, w2t, b2, w3t_eff, b3, w4t_pad, b4_pad)

    # Slice the lane-padded slab back to the true class count.
    return out[:, :num_classes]


def init_params(key, input_dim=32, num_classes=10):
    """Deterministic PyTorch-Linear-style init: U(-1/sqrt(fan_in), 1/sqrt(fan_in))."""
    def linear(key, fan_in, fan_out):
        kw, kb = jax.random.split(key)
        bound = 1.0 / jnp.sqrt(jnp.float32(fan_in))
        # PyTorch stores W as (out, in); we keep the transposed (in, out) layout.
        w_t = jax.random.uniform(kw, (fan_in, fan_out), jnp.float32, -bound, bound)
        b = jax.random.uniform(kb, (1, fan_out), jnp.float32, -bound, bound)
        return w_t, b

    k1, k2, k3, k4 = jax.random.split(key, 4)
    w1t, b1 = linear(k1, input_dim, 32)   # fc1: Linear(input_dim, 32)
    w2t, b2 = linear(k2, 32, 32)          # fc2: Linear(32, 32)
    w3t, b3 = linear(k3, 64, 64)          # fc3: Linear(64, 64)
    w4t, b4 = linear(k4, 64, num_classes) # fc4: Linear(64, num_classes)
    return dict(w1t=w1t, b1=b1, w2t=w2t, b2=b2,
                w3t=w3t, b3=b3, w4t=w4t, b4=b4)


def mlp_ref(x, params):
    """Pure-JAX reference (same fc2->fc3 mismatch handling: only the first 32
    rows of fc3's weight contribute)."""
    h1 = jax.nn.relu(x @ params["w1t"] + params["b1"])
    h2 = jax.nn.relu(h1 @ params["w2t"] + params["b2"])
    h3 = jax.nn.relu(h2 @ params["w3t"][:32, :] + params["b3"])
    return h3 @ params["w4t"] + params["b4"]


if __name__ == "__main__":
    key = jax.random.PRNGKey(0)
    kx, kp = jax.random.split(key)

    B, input_dim, num_classes = 16, 32, 10
    x = jax.random.normal(kx, (B, input_dim), jnp.float32)
    params = init_params(kp, input_dim=input_dim, num_classes=num_classes)

    out = mlp_forward(x, params)           # tm auto-picked (here: 8 -> 2 grid steps)
    out = jax.block_until_ready(out)

    ref = mlp_ref(x, params)
    assert out.shape == (B, num_classes), out.shape
    assert jnp.allclose(out, ref, atol=1e-4, rtol=1e-4), "mismatch vs JAX reference"

    print("KERNEL_OK")
</pallas_src>

<mosaic_0001>
module attributes {stable_mosaic.version = 11 : i64} {
  func.func @mlp_kernel(%arg0: i32, %arg1: memref<8x32xf32, #tpu.memory_space<vmem>>, %arg2: memref<32x32xf32, #tpu.memory_space<vmem>>, %arg3: memref<1x32xf32, #tpu.memory_space<vmem>>, %arg4: memref<32x32xf32, #tpu.memory_space<vmem>>, %arg5: memref<1x32xf32, #tpu.memory_space<vmem>>, %arg6: memref<32x64xf32, #tpu.memory_space<vmem>>, %arg7: memref<1x64xf32, #tpu.memory_space<vmem>>, %arg8: memref<64x128xf32, #tpu.memory_space<vmem>>, %arg9: memref<1x128xf32, #tpu.memory_space<vmem>>, %arg10: memref<8x128xf32, #tpu.memory_space<vmem>>) attributes {dimension_semantics = [#tpu.dimension_semantics<parallel>], iteration_bounds = array<i64: 2>, scalar_prefetch = 0 : i64, scratch_operands = 0 : i64, tpu.core_type = #tpu.core_type<tc>, window_params = [{transform_indices = @transform_0, window_bounds = array<i64: 8, 32>}, {pipeline_mode = #tpu.pipeline_mode<synchronous>, transform_indices = @transform_1, window_bounds = array<i64: 32, 32>}, {pipeline_mode = #tpu.pipeline_mode<synchronous>, transform_indices = @transform_2, window_bounds = array<i64: 1, 32>}, {pipeline_mode = #tpu.pipeline_mode<synchronous>, transform_indices = @transform_3, window_bounds = array<i64: 32, 32>}, {pipeline_mode = #tpu.pipeline_mode<synchronous>, transform_indices = @transform_4, window_bounds = array<i64: 1, 32>}, {pipeline_mode = #tpu.pipeline_mode<synchronous>, transform_indices = @transform_5, window_bounds = array<i64: 32, 64>}, {pipeline_mode = #tpu.pipeline_mode<synchronous>, transform_indices = @transform_6, window_bounds = array<i64: 1, 64>}, {pipeline_mode = #tpu.pipeline_mode<synchronous>, transform_indices = @transform_7, window_bounds = array<i64: 64, 128>}, {pipeline_mode = #tpu.pipeline_mode<synchronous>, transform_indices = @transform_8, window_bounds = array<i64: 1, 128>}, {transform_indices = @transform_9, window_bounds = array<i64: 8, 128>}]} {
    %c0 = arith.constant 0 : index
    %c0_0 = arith.constant 0 : index
    %0 = vector.load %arg1[%c0, %c0_0] : memref<8x32xf32, #tpu.memory_space<vmem>>, vector<8x32xf32>
    %c0_1 = arith.constant 0 : index
    %c0_2 = arith.constant 0 : index
    %1 = vector.load %arg2[%c0_1, %c0_2] : memref<32x32xf32, #tpu.memory_space<vmem>>, vector<32x32xf32>
    %cst = arith.constant dense<0.000000e+00> : vector<8x32xf32>
    %2 = tpu.matmul %0, %1, %cst {dimension_numbers = #tpu.dot_dimension_numbers<[1], [0], [0], [1], [0, 0, 1, 1], [], []>} : vector<8x32xf32>, vector<32x32xf32>, vector<8x32xf32> -> vector<8x32xf32>
    %c0_3 = arith.constant 0 : index
    %c0_4 = arith.constant 0 : index
    %3 = vector.load %arg3[%c0_3, %c0_4] : memref<1x32xf32, #tpu.memory_space<vmem>>, vector<1x32xf32>
    %4 = vector.broadcast %3 : vector<1x32xf32> to vector<8x32xf32>
    %5 = arith.addf %2, %4 : vector<8x32xf32>
    %cst_5 = arith.constant 0.000000e+00 : f32
    %6 = vector.broadcast %cst_5 : f32 to vector<8x32xf32>
    %7 = arith.maximumf %5, %6 : vector<8x32xf32>
    %c0_6 = arith.constant 0 : index
    %c0_7 = arith.constant 0 : index
    %8 = vector.load %arg4[%c0_6, %c0_7] : memref<32x32xf32, #tpu.memory_space<vmem>>, vector<32x32xf32>
    %cst_8 = arith.constant dense<0.000000e+00> : vector<8x32xf32>
    %9 = tpu.matmul %7, %8, %cst_8 {dimension_numbers = #tpu.dot_dimension_numbers<[1], [0], [0], [1], [0, 0, 1, 1], [], []>} : vector<8x32xf32>, vector<32x32xf32>, vector<8x32xf32> -> vector<8x32xf32>
    %c0_9 = arith.constant 0 : index
    %c0_10 = arith.constant 0 : index
    %10 = vector.load %arg5[%c0_9, %c0_10] : memref<1x32xf32, #tpu.memory_space<vmem>>, vector<1x32xf32>
    %11 = vector.broadcast %10 : vector<1x32xf32> to vector<8x32xf32>
    %12 = arith.addf %9, %11 : vector<8x32xf32>
    %cst_11 = arith.constant 0.000000e+00 : f32
    %13 = vector.broadcast %cst_11 : f32 to vector<8x32xf32>
    %14 = arith.maximumf %12, %13 : vector<8x32xf32>
    %c0_12 = arith.constant 0 : index
    %c0_13 = arith.constant 0 : index
    %15 = vector.load %arg6[%c0_12, %c0_13] : memref<32x64xf32, #tpu.memory_space<vmem>>, vector<32x64xf32>
    %cst_14 = arith.constant dense<0.000000e+00> : vector<8x64xf32>
    %16 = tpu.matmul %14, %15, %cst_14 {dimension_numbers = #tpu.dot_dimension_numbers<[1], [0], [0], [1], [0, 0, 1, 1], [], []>} : vector<8x32xf32>, vector<32x64xf32>, vector<8x64xf32> -> vector<8x64xf32>
    %c0_15 = arith.constant 0 : index
    %c0_16 = arith.constant 0 : index
    %17 = vector.load %arg7[%c0_15, %c0_16] : memref<1x64xf32, #tpu.memory_space<vmem>>, vector<1x64xf32>
    %18 = vector.broadcast %17 : vector<1x64xf32> to vector<8x64xf32>
    %19 = arith.addf %16, %18 : vector<8x64xf32>
    %cst_17 = arith.constant 0.000000e+00 : f32
    %20 = vector.broadcast %cst_17 : f32 to vector<8x64xf32>
    %21 = arith.maximumf %19, %20 : vector<8x64xf32>
    %c0_18 = arith.constant 0 : index
    %c0_19 = arith.constant 0 : index
    %22 = vector.load %arg8[%c0_18, %c0_19] : memref<64x128xf32, #tpu.memory_space<vmem>>, vector<64x128xf32>
    %cst_20 = arith.constant dense<0.000000e+00> : vector<8x128xf32>
    %23 = tpu.matmul %21, %22, %cst_20 {dimension_numbers = #tpu.dot_dimension_numbers<[1], [0], [0], [1], [0, 0, 1, 1], [], []>} : vector<8x64xf32>, vector<64x128xf32>, vector<8x128xf32> -> vector<8x128xf32>
    %c0_21 = arith.constant 0 : index
    %c0_22 = arith.constant 0 : index
    %24 = vector.load %arg9[%c0_21, %c0_22] : memref<1x128xf32, #tpu.memory_space<vmem>>, vector<1x128xf32>
    %25 = vector.broadcast %24 : vector<1x128xf32> to vector<8x128xf32>
    %26 = arith.addf %23, %25 : vector<8x128xf32>
    %c0_23 = arith.constant 0 : index
    %c0_24 = arith.constant 0 : index
    %27 = vector.load %arg10[%c0_23, %c0_24] : memref<8x128xf32, #tpu.memory_space<vmem>>, vector<8x128xf32>
    tpu.vector_store %arg10[%c0_23, %c0_24], %26 {strides = array<i32>} : memref<8x128xf32, #tpu.memory_space<vmem>>, vector<8x128xf32>,
    return
  }
  func.func @transform_0(%arg0: i32) -> (i32, i32) {
    %c0_i32 = arith.constant 0 : i32
    %c0_i32_0 = arith.constant 0 : i32
    return %arg0, %c0_i32 : i32, i32
  }
  func.func @transform_1(%arg0: i32) -> (i32, i32) {
    %c0_i32 = arith.constant 0 : i32
    %c0_i32_0 = arith.constant 0 : i32
    %c0_i32_1 = arith.constant 0 : i32
    return %c0_i32, %c0_i32_0 : i32, i32
  }
  func.func @transform_2(%arg0: i32) -> (i32, i32) {
    %c0_i32 = arith.constant 0 : i32
    %c0_i32_0 = arith.constant 0 : i32
    %c0_i32_1 = arith.constant 0 : i32
    return %c0_i32, %c0_i32_0 : i32, i32
  }
  func.func @transform_3(%arg0: i32) -> (i32, i32) {
    %c0_i32 = arith.constant 0 : i32
    %c0_i32_0 = arith.constant 0 : i32
    %c0_i32_1 = arith.constant 0 : i32
    return %c0_i32, %c0_i32_0 : i32, i32
  }
  func.func @transform_4(%arg0: i32) -> (i32, i32) {
    %c0_i32 = arith.constant 0 : i32
    %c0_i32_0 = arith.constant 0 : i32
    %c0_i32_1 = arith.constant 0 : i32
    return %c0_i32, %c0_i32_0 : i32, i32
  }
  func.func @transform_5(%arg0: i32) -> (i32, i32) {
    %c0_i32 = arith.constant 0 : i32
    %c0_i32_0 = arith.constant 0 : i32
    %c0_i32_1 = arith.constant 0 : i32
    return %c0_i32, %c0_i32_0 : i32, i32
  }
  func.func @transform_6(%arg0: i32) -> (i32, i32) {
    %c0_i32 = arith.constant 0 : i32
    %c0_i32_0 = arith.constant 0 : i32
    %c0_i32_1 = arith.constant 0 : i32
    return %c0_i32, %c0_i32_0 : i32, i32
  }
  func.func @transform_7(%arg0: i32) -> (i32, i32) {
    %c0_i32 = arith.constant 0 : i32
    %c0_i32_0 = arith.constant 0 : i32
    %c0_i32_1 = arith.constant 0 : i32
    return %c0_i32, %c0_i32_0 : i32, i32
  }
  func.func @transform_8(%arg0: i32) -> (i32, i32) {
    %c0_i32 = arith.constant 0 : i32
    %c0_i32_0 = arith.constant 0 : i32
    %c0_i32_1 = arith.constant 0 : i32
    return %c0_i32, %c0_i32_0 : i32, i32
  }
  func.func @transform_9(%arg0: i32) -> (i32, i32) {
    %c0_i32 = arith.constant 0 : i32
    %c0_i32_0 = arith.constant 0 : i32
    return %arg0, %c0_i32 : i32, i32
  }
}

</mosaic_0001>

<bundles_post_ra>
// kernel: tpu_custom_call.1
= control target key start
LH: loop header
LB: loop body
LE: loop exit
PB: predicated region body
PF: predicated region fallthrough
CT: control target
= control target key end

     0   :  { %s1604_s0 = inlined_call_operand.hbm [shape: f32[16,32], index: 0, kind: input, shape index: {}]   ;;  %s1605_s1 = inlined_call_operand.hbm [shape: f32[32,32], index: 1, kind: input, shape index: {}]   ;;  %s1606_s2 = inlined_call_operand.vmem [shape: f32[1,32], index: 2, kind: input, shape index: {}]   ;;  %s1607_s3 = inlined_call_operand.hbm [shape: f32[32,32], index: 3, kind: input, shape index: {}]   ;;  %s1608_s4 = inlined_call_operand.vmem [shape: f32[1,32], index: 4, kind: input, shape index: {}]   ;;  %s1609_s5 = inlined_call_operand.hbm [shape: f32[32,64], index: 5, kind: input, shape index: {}]   ;;  %s1610_s6 = inlined_call_operand.vmem [shape: f32[1,64], index: 6, kind: input, shape index: {}]   ;;  %s1611_s7 = inlined_call_operand.hbm [shape: f32[64,128], index: 7, kind: input, shape index: {}]   ;;  %s1612_s8 = inlined_call_operand.vmem [shape: f32[1,128], index: 8, kind: input, shape index: {}]   ;;  %s1613_s9 = inlined_call_operand.hbm [shape: f32[16,128], index: 9, kind: output, shape index: {}]  }
   0x1   :  { %1618 = sst [smem:[#allocation16_spill]] %s1605_s1 }
   0x2   :  { %1619 = sst [smem:[#allocation17_spill]] %s1607_s3 }
   0x3   :  { %1620 = sst [smem:[#allocation18_spill]] %s1609_s5 }
   0x4   :  { %1621 = sst [smem:[#allocation19_spill]] %s1611_s7 }
   0x5   :  { %14 = vsyncpa [#allocation3], 0 }
   0x6   :  { %16 = vsyncpa [#allocation3 + $0x1], 0 }
   0x7   :  { %17 = vsyncpa [#allocation6], 0 }
   0x8   :  { %18 = vsyncpa [#allocation9], 0 }
   0x9   :  { %19 = vsyncpa [#allocation4], 0 }
   0xa   :  { %21 = vsyncpa [#allocation4 + $0x1], 0  ;;  %s1336_s30 = smov 0   ;;  %s1338_s10 = smov 0  }
   0xb   :  { %s1340_s11 = smov 0   ;;  %s1342_s12 = smov 0  }
   0xc LB: > { %s1276_s13 = smov [#allocation5]   ;;  %s1357_s15 = sadd.s32 4294967295, %s1274_s12   ;;  %s1274_s12 = sphi %s1342_s12, %s1645_s12   ;;  %s1270_s11 = sphi %s1340_s11, %s1644_s11   ;;  %s1266_s10 = sphi %s1338_s10, %s1643_s10   ;;  %s1262_s30 = sphi %s1336_s30, %s1642_s30  }
   0xd   : > { %s264_s14 = sshll.u32 %s1276_s13, 4  ;;  %p876_p0 = scmp.ge.s32.totalorder %s1274_s12, 1  ;;  %s265_s14 = int_to_ptr.vmem [resolvable:$true] %s264_s14 }
   0xe   : > { %p1614_p1 = scmp.eq.s32.totalorder %s1357_s15, 0  ;;  %p252_p2 = scmp.lt.s32.totalorder %s1274_s12, 3 }
   0xf   : > { %s1277_s17 = smov [#allocation8]   ;;  %s1278_s20 = smov [#allocation7]  }
  0x10   : > { %p1362_p3 = pnand %p876_p0, %p252_p2  ;;  %s296_s18 = sshll.u32 %s1277_s17, 4  ;;  %s1375_s18 = int_to_ptr.vmem [resolvable:$true] %s296_s18 }
  0x11   : > { %s280_s21 = sshll.u32 %s1278_s20, 4  ;;  %s1081_s22 = scalar_lea.vmem %s265_s14, 512  ;;  %s1377_s21 = int_to_ptr.vmem [resolvable:$true] %s280_s21 }
  0x12   : > { %s1622_s16 = scalar_select %p1362_p3, 1, 0 }
  0x13   : > { %p999_p5 = pneg %p1362_p3  ;;  %p1082_p8 = scmp.ne.s32.totalorder %s265_s14, %s1081_s22 }
  0x14   : > { %p1089_p11 = scmp.lt.s32.totalorder %s265_s14, %s265_s14  ;;  %p1090_p12 = scmp.lt.s32.totalorder %s1081_s22, %s1081_s22 }
  0x15   : > { %p1371_p6 = pnand %p999_p5, %p1614_p1 }
  0x16   : > { %p1091_p13 = por %p1090_p12, %p1089_p11 }
  0x17   : > { %p1072_p7 = pneg %p1371_p6 }
  0x19   : > { %p1084_p9 = pnand %p1082_p8, %p1072_p7 }
  0x1b   : > { %p1085_p10 = pneg %p1084_p9 }
  0x1d   : > { %p1092_p0 = pnand %p1091_p13, %p1085_p10 }
  0x1f   : > { %1095 = shalt.err (!%p1092_p0)
}
  0x20   : > { %s1279_s23 = smov 128   ;;  %s1280_s24 = smov 8  }
  0x21   : > { %s1624_s1 = sld [smem:[#allocation16_spill]]  ;;  %s1107_s27 = scalar_lea.vmem %s1375_s18, 512 }
  0x22   : > { %p1108_p2 = scmp.ne.s32.totalorder %s1375_s18, %s1107_s27  ;;  %p1115_p9 = scmp.lt.s32.totalorder %s1375_s18, %s1375_s18 }
  0x23   : > { %p1116_p10 = scmp.lt.s32.totalorder %s1107_s27, %s1107_s27 }
  0x24   : > { %p1110_p5 = pnand %p1108_p2, %p1072_p7 }
  0x25   : > { %p1117_p11 = por %p1116_p10, %p1115_p9 }
  0x26   : > { %p1111_p8 = pneg %p1110_p5 }
  0x27   : > { %1002 = dma.hbm_to_vmem [thread:$0]  (!%p1371_p6), %s1624_s1, 512, %s265_s14, [#allocation6], %s1279_s23, %s1279_s23, %s1280_s24  }
  0x28   : > { %p1118_p12 = pnand %p1117_p11, %p1111_p8 }
  0x2a   : > { %1121 = shalt.err (!%p1118_p12)
}
  0x2b   : > { %s1625_s5 = sld [smem:[#allocation18_spill]]  ;;  %s1133_s13 = scalar_lea.vmem %s1377_s21, 512 }
  0x2c   : > { %p1134_p13 = scmp.ne.s32.totalorder %s1377_s21, %s1133_s13  ;;  %p1141_p5 = scmp.lt.s32.totalorder %s1377_s21, %s1377_s21 }
  0x2d   : > { %p1142_p8 = scmp.lt.s32.totalorder %s1133_s13, %s1133_s13 }
  0x2e   : > { %p1136_p0 = pnand %p1134_p13, %p1072_p7 }
  0x2f   : > { %p1143_p9 = por %p1142_p8, %p1141_p5 }
  0x30   : > { %p1137_p2 = pneg %p1136_p0 }
  0x31   : > { %1008 = dma.hbm_to_vmem [thread:$0]  (!%p1371_p6), %s1625_s5, 512, %s1375_s18, [#allocation9], %s1279_s23, %s1279_s23, %s1280_s24  }
  0x32   : > { %p1144_p10 = pnand %p1143_p9, %p1137_p2 }
  0x34   : > { %1147 = shalt.err (!%p1144_p10)
}
  0x35   : > { %s1626_s3 = sld [smem:[#allocation17_spill]]  ;;  %s1281_s18 = smov [#allocation10]  }
  0x36   : > { %s312_s20 = sshll.u32 %s1281_s18, 4  ;;  %s313_s20 = int_to_ptr.vmem [resolvable:$true] %s312_s20 }
  0x37   : > { %s1159_s22 = scalar_lea.vmem %s313_s20, 1024  ;;  %p1167_p0 = scmp.lt.s32.totalorder %s313_s20, %s313_s20 }
  0x38   : > { %p1160_p11 = scmp.ne.s32.totalorder %s313_s20, %s1159_s22  ;;  %p1168_p2 = scmp.lt.s32.totalorder %s1159_s22, %s1159_s22 }
  0x3a   : > { %p1162_p12 = pnand %p1160_p11, %p1072_p7  ;;  %p1169_p5 = por %p1168_p2, %p1167_p0 }
  0x3b   : > { %1005 = dma.hbm_to_vmem [thread:$0]  (!%p1371_p6), %s1626_s3, 512, %s1377_s21, [#allocation6], %s1279_s23, %s1279_s23, %s1280_s24  }
  0x3c   : > { %p1163_p13 = pneg %p1162_p12 }
  0x3e   : > { %p1170_p8 = pnand %p1169_p5, %p1163_p13 }
  0x40   : > { %1173 = shalt.err (!%p1170_p8)
}
  0x41   : > { %s1627_s7 = sld [smem:[#allocation19_spill]]  ;;  %s875_s19 = sadd.s32 4294967294, %s1274_s12  }
  0x42   : > { %s1437_s26 = sadd.s32 1, %s1274_s12   ;;  %s34_s28 = sadd.s32 1, %s1270_s11 }
  0x43   : > { %s31_s27 = ssub.s32 %s1274_s12, %s1437_s26  ;;  %p41_p9 = scmp.ne.s32.totalorder %s1270_s11, %s1266_s10 }
  0x44   : > { %p32_p7 = scmp.eq.s32.totalorder %s31_s27, 0  ;;  %p42_p10 = scmp.eq.s32.totalorder %s1274_s12, 0 }
  0x45   : > { %p47_p11 = scmp.ne.s32.totalorder %s1266_s10, %s1262_s30  ;;  %p239_p13 = scmp.eq.s32.totalorder %s1357_s15, 1 }
  0x46   : > { %s1448_s29 = scalar_select %p32_p7, %s1270_s11, %s34_s28  }
  0x47   : > { %1011 = dma.hbm_to_vmem [thread:$0]  (!%p1371_p6), %s1627_s7, 1024, %s313_s20, [#allocation9], %s1279_s23, %s1279_s23, %s1280_s24  }
  0x48   : > { %p1450_p12 = por %p42_p10, %p41_p9  ;;  %p1456_p6 = por %p1614_p1, %p47_p11 }
  0x49   : > { %p245_p0 = scmp.eq.s32.totalorder %s875_s19, 1  ;;  %p1024_p2 = scmp.lt.s32.totalorder %s1274_s12, 2 }
  0x4a   : > { %s1629_s23 = scalar_select %p1456_p6, 1, 0 }
  0x4b   : > { %s329_s24 = sand.u32 1, %s1270_s11   ;;  %p1463_p5 = por %p239_p13, %p41_p9 }
  0x4c   : > { %p1467_p8 = por %p245_p0, %p47_p11  ;;  %s882_s18 = sshll.u32 %s329_s24, 3 }
  0x4d   : > { %s1630_s14 = scalar_select %p1463_p5, 1, 0 }
  0x4e   : > { %s1631_s17 = scalar_select %p1467_p8, 1, 0 }
  0x4f   : > { %s883_s20 = sshll.u32 %s1274_s12, 7  ;;  %s333_s19 = scalar_lea.vmem [#allocation2], %s882_s18 }
  0x50   : > { %s1475_s25 = scalar_lea.hbm %s1604_s0, %s883_s20  ;;  %s340_s27 = sshll.u32 %s333_s19, 4  ;;  %s341_s27 = int_to_ptr.vmem [resolvable:$true] %s340_s27 }
  0x51   : > { %p1479_p7 = pnand %p1024_p2, %p1450_p12  ;;  %s330_s1 = scalar_lea.sflag [#allocation3], %s329_s24 }
  0x52   : > { %s1174_s3 = scalar_lea.hbm %s1475_s25, 128  ;;  %s1179_s21 = scalar_lea.hbm %s1604_s0, 256 }
  0x53   : > { %p1175_p9 = scmp.ne.s32.totalorder %s1475_s25, %s1174_s3  ;;  %p1176_p10 = pneg %p1479_p7 }
  0x54   : > { %p1180_p0 = scmp.lt.s32.totalorder %s1475_s25, %s1604_s0  ;;  %p1181_p12 = scmp.lt.s32.totalorder %s1179_s21, %s1174_s3 }
  0x55   : > { %p1177_p11 = pnand %p1176_p10, %p1175_p9 }
  0x56   : > { %p1182_p2 = por %p1181_p12, %p1180_p0 }
  0x57   : > { %p1178_p13 = pneg %p1177_p11 }
  0x59   : > { %p1183_p4 = pnand %p1182_p2, %p1178_p13 }
  0x5b   : > { %1186 = shalt.err (!%p1183_p4)
}
  0x5c   : > { %s1187_s13 = scalar_lea.vmem %s341_s27, 128  ;;  %s1282_s24 = smov [#allocation2]  }
  0x5d   : > { %p1188_p1 = scmp.ne.s32.totalorder %s341_s27, %s1187_s13  ;;  %s1192_s5 = sshll.u32 %s1282_s24, 4  ;;  %s1193_s5 = int_to_ptr.vmem [resolvable:$false] %s1192_s5 }
  0x5e   : > { %s1194_s7 = scalar_lea.vmem %s1193_s5, 256  ;;  %p1195_p9 = scmp.lt.s32.totalorder %s341_s27, %s1193_s5 }
  0x5f   : > { %p1190_p8 = pnand %p1188_p1, %p1176_p10  ;;  %p1196_p11 = scmp.lt.s32.totalorder %s1194_s7, %s1187_s13 }
  0x61   : > { %p1191_p5 = pneg %p1190_p8  ;;  %p1197_p6 = por %p1196_p11, %p1195_p9 }
  0x63   : > { %p1198_p3 = pnand %p1197_p6, %p1191_p5 }
  0x65   : > { %1201 = shalt.err (!%p1198_p3)
}
  0x66   : > { %1015 = dma.hbm_to_vmem [thread:$0]  (!%p1479_p7), %s1475_s25, 128, %s341_s27, %s330_s1  }
  0x67   : > { %p1633_p13 = scmp.ne.s32.totalorder %s1622_s16, 0 }
  0x68   : > { %s1500_s3 = sand.u32 (!%p1633_p13), 1, %s1266_s10   ;;  %p1634_p1 = scmp.ne.s32.totalorder (!%p1633_p13), %s1629_s23, 0 }
  0x69   : > { %349 = sbr.rel (%p1633_p13) target bundleno = 926 (0x39e), region = 56  ;;  %s885_s20 = sshll.u32 (!%p1633_p13), %s1500_s3, 3 }
  0x6a   : > { %s352_s5 = scalar_lea.sflag (!%p1633_p13), [#allocation3], %s1500_s3  ;;  %s355_s7 = scalar_lea.vmem (!%p1633_p13), [#allocation2], %s885_s20 }
  0x6e   : > { %1245 = dma.done.wait (%p1634_p1), %s352_s5, 128  }
  0x6f   : > { %1247 = vsyncadd (%p1634_p1), %s352_s5, 4294967168  ;;  %p1635_p3 = scmp.eq.s32.totalorder %s1357_s15, 0 }
  0x71   : > { %1249 = dma.done.wait (%p1635_p3), [#allocation6], 1024   ;;  %p1636_p4 = pmov %p1635_p3 }
  0x72   : > { %p1637_p6 = pmov %p1635_p3 }
  0x73   : > { %1251 = vsyncadd (%p1636_p4), [#allocation6], 4294966272 }
  0x74   : > { %1253 = dma.done.wait (%p1637_p6), [#allocation9], 1536   ;;  %p1638_p5 = pmov %p1635_p3 }
  0x75   : > { %v1283_v0 = vmov 0.0   ;;  %vm1284_vm0 = vmmov 0   ;;  %v410_v1 = vld [vmem:[#allocation5 + $0x18] sm:$0xff]  ;;  %v409_v2 = vld [vmem:[#allocation5 + $0x10] sm:$0xff]  ;;  %v408_v4 = vld [vmem:[#allocation5 + $0x8] sm:$0xff]  ;;  %vm418_vm1 = vcmask 261120  }
  0x76   : > { %1255 = vsyncadd (%p1638_p5), [#allocation9], 4294965760  ;;  %927 = vmatprep.subr.mxu0 %v1283_v0  ;;  %935 = vmatprep.mubr.msk.f32.mxu0 %vm1284_vm0, %v1283_v0  ;;  %v496_v3 = vld [vmem:[#allocation7 + $0x18] sm:$0xff]  ;;  %v407_v5 = vld [vmem:[#allocation5] sm:$0xff]  ;;  %vm678_vm2 = vcmask 523264   ;;  %s900_s18 = sshll.u32 %s1357_s15, 7 }
  0x77   : > { %938 = vmatprep.subr.mxu1 %v1283_v0  ;;  %946 = vmatprep.mubr.msk.f32.mxu1 %vm1284_vm0, %v1283_v0  ;;  %v406_v6 = vld [vmem:[%s355_s7] sm:$0xff]  ;;  %v494_v8 = vld [vmem:[#allocation7 + $0x8] sm:$0xff]  ;;  %v493_v9 = vld [vmem:[#allocation7] sm:$0xff]  ;;  %s405_s19 = scalar_lea.vmem [#allocation11], %s885_s20  ;;  %s1567_s7 = scalar_lea.hbm %s1613_s9, %s900_s18 }
  0x78   : > { %928 = vmatpush3.msra.mxu0 %v410_v1  ;;  %939 = vmatpush3.msra.mxu1 %v496_v3  ;;  %v495_v7 = vld [vmem:[#allocation7 + $0x10] sm:$0xff]  ;;  %v581_v10 = vld [vmem:[#allocation8 + $0x18] sm:$0xff]  ;;  %v579_v17 = vld [vmem:[#allocation8 + $0x8] sm:$0xff]  ;;  %s767_s13 = sshll.u32 %s405_s19, 4  ;;  %s754_s1 = scalar_lea.sflag [#allocation4], %s1500_s3  ;;  %s768_s13 = int_to_ptr.vmem [resolvable:$true] %s767_s13 }
  0x79   : > { %929 = vmatprep.subr.mxu0 %v1283_v0  ;;  %940 = vmatprep.subr.mxu1 %v1283_v0  ;;  %v891_v11 = vld [vmem:[%s1606_s2] ss:$0 sm:$0xff]  ;;  %v578_v18 = vld [vmem:[#allocation8] sm:$0xff]  ;;  %v670_v19 = vld [vmem:[#allocation10 + $0x38] sm:$0xff]  ;;  %s1202_s16 = scalar_lea.vmem %s768_s13, 128  ;;  %p1639_p7 = scmp.ne.s32.totalorder %s1630_s14, 0 }
  0x7a   : > { %930 = vmatpush3.msra.mxu0 %v409_v2  ;;  %941 = vmatpush3.msra.mxu1 %v495_v7  ;;  %v580_v16 = vld [vmem:[#allocation8 + $0x10] sm:$0xff]  ;;  %v668_v21 = vld [vmem:[#allocation10 + $0x28] sm:$0xff]  ;;  %v667_v22 = vld [vmem:[#allocation10 + $0x20] sm:$0xff]  ;;  %p1203_p8 = scmp.ne.s32.totalorder %s768_s13, %s1202_s16  ;;  %s1285_s15 = smov [#allocation11]  }
  0x7b   : > { %931 = vmatprep.subr.mxu0 %v1283_v0  ;;  %942 = vmatprep.subr.mxu1 %v1283_v0  ;;  %v669_v20 = vld [vmem:[#allocation10 + $0x30] sm:$0xff]  ;;  %v666_v23 = vld [vmem:[#allocation10 + $0x18] sm:$0xff]  ;;  %v664_v30 = vld [vmem:[#allocation10 + $0x8] sm:$0xff]  ;;  %s1206_s23 = sshll.u32 %s1285_s15, 4  ;;  %s1207_s23 = int_to_ptr.vmem [resolvable:$false] %s1206_s23 }
  0x7c   : > { %932 = vmatpush3.msra.mxu0 %v408_v4  ;;  %943 = vmatpush3.msra.mxu1 %v494_v8  ;;  %v893_v24 = vld [vmem:[%s1608_s4] ss:$0 sm:$0xff]  ;;  %v663_v31 = vld [vmem:[#allocation10] sm:$0xff]  ;;  %p1204_p10 = pnand %p1203_p8, %p1639_p7  ;;  %s1208_s20 = scalar_lea.vmem %s1207_s23, 256 }
  0x7d   : > { %933 = vmatprep.subr.mxu0 %v1283_v0  ;;  %944 = vmatprep.subr.mxu1 %v1283_v0  ;;  %v665_v29 = vld [vmem:[#allocation10 + $0x10] sm:$0xff]  ;;  %p1209_p12 = scmp.lt.s32.totalorder %s768_s13, %s1207_s23  ;;  %p1210_p2 = scmp.lt.s32.totalorder %s1208_s20, %s1202_s16 }
  0x7e   : > { %934 = vmatpush3.msra.mxu0 %v407_v5  ;;  %945 = vmatpush3.msra.mxu1 %v493_v9  ;;  %v895_v32 = vld [vmem:[%s1610_s6] ss:$0 sm:$0xff]  ;;  %p1205_p0 = pneg %p1204_p10 }
  0x7f   : > { %936 = vmatmul.mubr.msk.f32.vlgmr.msra.gmra.mxu0 %vm418_vm1, %v406_v6  ;;  %949 = vmatprep.subr.mxu0 %v1283_v0  ;;  %v897_v37 = vld [vmem:[%s1612_s8] ss:$0 sm:$0xff]  ;;  %p1211_p9 = por %p1210_p2, %p1209_p12 }
  0x80   : > { %957 = vmatprep.mubr.msk.f32.mxu0 %vm1284_vm0, %v1283_v0  ;;  %960 = vmatprep.subr.mxu1 %v1283_v0 }
  0x81   : > { %950 = vmatpush3.msra.mxu0 %v581_v10  ;;  %p1212_p11 = pnand %p1211_p9, %p1205_p0 }
  0x82   : > { %951 = vmatprep.subr.mxu0 %v1283_v0 }
  0x83   : > { %952 = vmatpush3.msra.mxu0 %v580_v16 }
  0x84   : > { %953 = vmatprep.subr.mxu0 %v1283_v0 }
  0x85   : > { %954 = vmatpush3.msra.mxu0 %v579_v17 }
  0x86   : > { %955 = vmatprep.subr.mxu0 %v1283_v0 }
  0x87   : > { %956 = vmatpush3.msra.mxu0 %v578_v18 }
 0x13f   : > { %v488_v12 = vpop.f32.mrf.mxu0 }
 0x140   : > { %v489_v13 = vadd.f32 %v891_v11, %v488_v12 }
 0x141   : > { %v937_v14 = vpop.f32.mrf.mxu0 }
 0x142   : > { %v492_v15 = vmax.f32 %v489_v13, 0.0 }
 0x144   : > { %947 = vmatmul.mubr.msk.f32.vlgmr.msra.gmra.mxu1 %vm418_vm1, %v492_v15 }
 0x145   : > { %976 = vmatprep.mubr.msk.f32.mxu1 %vm1284_vm0, %v1283_v0  ;;  %961 = vmatpush3.msra.mxu1 %v670_v19 }
 0x146   : > { %962 = vmatprep.subr.mxu1 %v1283_v0 }
 0x147   : > { %963 = vmatpush3.msra.mxu1 %v669_v20 }
 0x148   : > { %964 = vmatprep.subr.mxu1 %v1283_v0 }
 0x149   : > { %965 = vmatpush3.msra.mxu1 %v668_v21 }
 0x14a   : > { %966 = vmatprep.subr.mxu1 %v1283_v0 }
 0x14b   : > { %967 = vmatpush3.msra.mxu1 %v667_v22 }
 0x14c   : > { %968 = vmatprep.subr.mxu1 %v1283_v0 }
 0x14d   : > { %969 = vmatpush3.msra.mxu1 %v666_v23 }
 0x14e   : > { %970 = vmatprep.subr.mxu1 %v1283_v0 }
 0x14f   : > { %971 = vmatpush3.msra.mxu1 %v665_v29 }
 0x150   : > { %972 = vmatprep.subr.mxu1 %v1283_v0 }
 0x151   : > { %973 = vmatpush3.msra.mxu1 %v664_v30 }
 0x152   : > { %974 = vmatprep.subr.mxu1 %v1283_v0 }
 0x153   : > { %975 = vmatpush3.msra.mxu1 %v663_v31 }
 0x204   : > { %v573_v25 = vpop.f32.mrf.mxu1 }
 0x205   : > { %v574_v26 = vadd.f32 %v893_v24, %v573_v25 }
 0x206   : > { %v948_v27 = vpop.f32.mrf.mxu1 }
 0x207   : > { %v577_v28 = vmax.f32 %v574_v26, 0.0 }
 0x209   : > { %958 = vmatmul.mubr.msk.f32.vlgmr.msra.gmra.mxu0 %vm418_vm1, %v577_v28 }
 0x2c9   : > { %v658_v33 = vpop.f32.mrf.mxu0 }
 0x2ca   : > { %v659_v34 = vadd.f32 %v895_v32, %v658_v33 }
 0x2cb   : > { %v959_v35 = vpop.f32.mrf.mxu0 }
 0x2cc   : > { %v662_v36 = vmax.f32 %v659_v34, 0.0 }
 0x2ce   : > { %977 = vmatmul.mubr.msk.f32.vlgmr.msra.gmra.mxu1 %vm678_vm2, %v662_v36 }
 0x38e   : > { %v748_v38 = vpop.f32.mrf.mxu1 }
 0x38f   : > { %v749_v39 = vadd.f32 %v897_v37, %v748_v38 }
 0x390   : > { %v978_v40 = vpop.f32.mrf.mxu1 }
 0x391   : > { %752 = vst [vmem:[%s405_s19] sm:$0xff] %v749_v39 }
 0x392   : > { %1215 = shalt.err (!%p1212_p11)
}
 0x393   : > { %s1216_s25 = scalar_lea.hbm %s1567_s7, 128  ;;  %s1220_s28 = scalar_lea.hbm %s1613_s9, 256 }
 0x394   : > { %p1217_p13 = scmp.ne.s32.totalorder %s1567_s7, %s1216_s25  ;;  %p1221_p4 = scmp.lt.s32.totalorder %s1567_s7, %s1613_s9 }
 0x395   : > { %p1222_p6 = scmp.lt.s32.totalorder %s1220_s28, %s1216_s25 }
 0x396   : > { %p1218_p1 = pnand %p1217_p13, %p1639_p7 }
 0x397   : > { %p1223_p5 = por %p1222_p6, %p1221_p4 }
 0x398   : > { %p1219_p3 = pneg %p1218_p1 }
 0x39a   : > { %p1224_p8 = pnand %p1223_p5, %p1219_p3 }
 0x39c   : > { %1227 = shalt.err (!%p1224_p8)
}
 0x39d   : > { %997 = dma.vmem_to_hbm [thread:$0]  (%p1639_p7), %s768_s13, 128, %s1567_s7, %s754_s1  }
 0x39e PF: > { %s779_s18 = sand.u32 1, %s1262_s30   ;;  %p1640_p10 = scmp.ne.s32.totalorder %s1631_s17, 0 }
 0x39f   : > { %p1641_p0 = scmp.ge.s32.totalorder %s1274_s12, 2  ;;  %s780_s19 = scalar_lea.sflag [#allocation4], %s779_s18 }
 0x3a1   : > { %p1017_p12 = pnand %p1641_p0, %p1640_p10 }
 0x3a3   : > { %p1018_p2 = pneg %p1017_p12 }
 0x3a5   : > { %1257 = dma.done.wait (%p1018_p2), %s780_s19, 128  }
 0x3a6   : > { %1259 = vsyncadd (%p1018_p2), %s780_s19, 4294967168  ;;  %p24_p9 = scmp.ge.s32.totalorder %s1437_s26, 4   ;;  %s1642_s30 = smov %s1266_s10 }
 0x3a7   : > { %s1643_s10 = smov %s1270_s11  ;;  %s1644_s11 = smov %s1448_s29 }
 0x3a8   : > { %s1645_s12 = smov %s1437_s26  ;;  %26 = sbr.rel (!%p24_p9) target bundleno = 12 (0xc), region = 117 }
 0x3ad   :  { %785 = vsyncpa [#allocation3], 1 }
 0x3ae   :  { %787 = vsyncpa [#allocation3 + $0x1], 1 }
 0x3af   :  { %788 = vsyncpa [#allocation6], 1 }
 0x3b0   :  { %789 = vsyncpa [#allocation9], 1 }
 0x3b1   :  { %790 = vsyncpa [#allocation4], 1 }
 0x3b2   :  { %792 = vsyncpa [#allocation4 + $0x1], 1 }

</bundles_post_ra>
